<compile_context>
chip_gen: v5e
topology: v5e:2x2
jax: 0.10.0
libtpu: 0.0.40
codegen_flags: <defaults>
</compile_context>

<pallas_src>
import jax
import jax.numpy as jnp
from jax.experimental import pallas as pl
from jax.experimental.pallas import tpu as pltpu


def _logistic_kernel(params_ref, x_ref, o_ref):
    # params_ref: (2,) f32 in SMEM -> [k, x0]
    # x_ref / o_ref: (block_rows, lane_w) VMEM tiles
    k = params_ref[0]
    x0 = params_ref[1]
    z = k * (x_ref[...].astype(jnp.float32) - x0)      # VPU (f32: safe on v5e)
    # sigmoid(z) = 0.5 * tanh(z/2) + 0.5: one EUP op, exact, result in [0, 1],
    # so clamp(.., 0, 1) is automatically satisfied (incl. the exp-overflow case).
    o_ref[...] = (0.5 * jnp.tanh(0.5 * z) + 0.5).astype(o_ref.dtype)


def _vmem_capacity_bytes():
    try:
        info = pltpu.get_tpu_info()
        return int(getattr(info, "vmem_capacity_bytes", 64 * 1024 * 1024))
    except Exception:
        return 64 * 1024 * 1024


def _choose_lane_width(n):
    """Largest lane-dense width that divides n (zero-copy path), else pad-to-128."""
    for lane_w in (1024, 512, 256, 128):
        if n % lane_w == 0:
            return lane_w, 0
    lane_w = 128
    return lane_w, (-n) % lane_w


def logistic_activation(x, k_param, x0=0.0):
    """clamp(1/(1+exp(-k*(x-x0))), 0, 1).squeeze() as a Pallas TPU kernel."""
    orig_shape = x.shape
    in_dtype = x.dtype
    out_dtype = in_dtype if jnp.issubdtype(in_dtype, jnp.floating) else jnp.float32
    in_itemsize = jnp.dtype(in_dtype).itemsize
    out_itemsize = jnp.dtype(out_dtype).itemsize

    n = x.size
    lane_w, pad = _choose_lane_width(n)
    rows = (n + pad) // lane_w

    flat = x.reshape(-1)                       # metadata-only
    if pad:                                    # rare fallback: n % 128 != 0
        flat = jnp.pad(flat, (0, pad))
    x2d = flat.reshape(rows, lane_w)           # metadata-only when pad == 0

    # Sublane packing: 8 for 4-byte, 16 for 2-byte, 32 for 1-byte dtypes.
    sub = max(max(8, 32 // in_itemsize), max(8, 32 // out_itemsize))

    # Chip-gated tile size: big tiles on 128 MiB-VMEM chips, modest on v7x.
    vmem_cap = _vmem_capacity_bytes()
    big_vmem = vmem_cap >= 100 * 1024 * 1024                  # v5e / v6e
    target_tile_bytes = (8 if big_vmem else 2) * 1024 * 1024  # input-tile bytes
    block_rows = max(sub, (target_tile_bytes // (lane_w * in_itemsize)) // sub * sub)
    # If the whole array is smaller than one tile, use the full row extent
    # (block dim equal to the array dim is always legal).
    block_rows = min(block_rows, rows)
    num_blocks = pl.cdiv(rows, block_rows)     # ragged last block handled by Pallas

    # Scalars live in SMEM; passing x0 at runtime avoids recompiles.
    params = jnp.concatenate([
        jnp.asarray(k_param, jnp.float32).reshape(-1)[:1],
        jnp.asarray([x0], jnp.float32),
    ])

    # Double-buffered (input tile + output tile) + headroom, capped at physical VMEM.
    pair_bytes = block_rows * lane_w * (in_itemsize + out_itemsize)
    vmem_limit = int(min(vmem_cap, max(2 * pair_bytes + (2 << 20), 8 << 20)))

    out2d = pl.pallas_call(
        _logistic_kernel,
        out_shape=jax.ShapeDtypeStruct((rows, lane_w), out_dtype),
        grid=(num_blocks,),
        in_specs=[
            pl.BlockSpec(memory_space=pltpu.MemorySpace.SMEM),      # [k, x0]
            pl.BlockSpec((block_rows, lane_w), lambda i: (i, 0)),   # x tile
        ],
        out_specs=pl.BlockSpec((block_rows, lane_w), lambda i: (i, 0)),
        compiler_params=pltpu.CompilerParams(
            dimension_semantics=("parallel",),
            vmem_limit_bytes=vmem_limit),
        cost_estimate=pl.CostEstimate(
            flops=5 * n,
            transcendentals=n,
            bytes_accessed=n * (in_itemsize + out_itemsize)),
    )(params, x2d)

    if pad:
        out = out2d.reshape(-1)[:n].reshape(orig_shape)
    else:
        out = out2d.reshape(orig_shape)        # metadata-only
    # Match torch .squeeze(): drop all size-1 dims.
    return jnp.squeeze(out)


if __name__ == "__main__":
    key = jax.random.PRNGKey(0)

    # Deterministic parameter init (mirrors LogisticActivation(x0=0, k=1)).
    x0 = 0.0
    k_param = jnp.array([1.0], dtype=jnp.float32)  # nn.Parameter(FloatTensor([k]))

    # Small NCHW-like input (f32, the module's native path).
    x = jax.random.normal(key, (2, 4, 16, 16), dtype=jnp.float32)
    out = jax.block_until_ready(logistic_activation(x, k_param, x0))

    ref = jnp.squeeze(jnp.clip(1.0 / (1.0 + jnp.exp(-k_param[0] * (x - x0))), 0.0, 1.0))
    assert out.shape == ref.shape and out.dtype == ref.dtype
    assert jnp.allclose(out, ref, atol=1e-5, rtol=1e-5)

    # Native-dtype I/O path (bf16 in / bf16 out, f32 compute inside the kernel).
    xb = x.astype(jnp.bfloat16)
    outb = jax.block_until_ready(logistic_activation(xb, k_param, x0))
    refb = jnp.squeeze(jnp.clip(
        1.0 / (1.0 + jnp.exp(-1.0 * (xb.astype(jnp.float32) - x0))), 0.0, 1.0))
    assert outb.shape == refb.shape and outb.dtype == jnp.bfloat16
    assert jnp.allclose(outb.astype(jnp.float32), refb, atol=1e-2, rtol=1e-2)

    print("KERNEL_OK")
</pallas_src>

<mosaic_0001>
module attributes {stable_mosaic.version = 11 : i64} {
  func.func @_logistic_kernel(%arg0: i32, %arg1: memref<2xf32, #tpu.memory_space<smem>>, %arg2: memref<2x1024xf32, #tpu.memory_space<vmem>>, %arg3: memref<2x1024xf32, #tpu.memory_space<vmem>>) attributes {dimension_semantics = [#tpu.dimension_semantics<parallel>], iteration_bounds = array<i64: 1>, scalar_prefetch = 0 : i64, scratch_operands = 0 : i64, tpu.core_type = #tpu.core_type<tc>, window_params = [{transform_indices = @transform_0, window_bounds = array<i64: 2>}, {transform_indices = @transform_1, window_bounds = array<i64: 2, 1024>}, {transform_indices = @transform_2, window_bounds = array<i64: 2, 1024>}]} {
    %c0 = arith.constant 0 : index
    %0 = memref.load %arg1[%c0] : memref<2xf32, #tpu.memory_space<smem>>
    %c1 = arith.constant 1 : index
    %1 = memref.load %arg1[%c1] : memref<2xf32, #tpu.memory_space<smem>>
    %c0_0 = arith.constant 0 : index
    %c0_1 = arith.constant 0 : index
    %2 = vector.load %arg2[%c0_0, %c0_1] : memref<2x1024xf32, #tpu.memory_space<vmem>>, vector<2x1024xf32>
    %3 = vector.broadcast %1 : f32 to vector<2x1024xf32>
    %4 = arith.subf %2, %3 : vector<2x1024xf32>
    %5 = vector.broadcast %0 : f32 to vector<2x1024xf32>
    %6 = arith.mulf %5, %4 : vector<2x1024xf32>
    %cst = arith.constant 5.000000e-01 : f32
    %7 = vector.broadcast %cst : f32 to vector<2x1024xf32>
    %8 = arith.mulf %7, %6 : vector<2x1024xf32>
    %9 = math.tanh %8 : vector<2x1024xf32>
    %cst_2 = arith.constant 5.000000e-01 : f32
    %10 = vector.broadcast %cst_2 : f32 to vector<2x1024xf32>
    %11 = arith.mulf %10, %9 : vector<2x1024xf32>
    %cst_3 = arith.constant 5.000000e-01 : f32
    %12 = vector.broadcast %cst_3 : f32 to vector<2x1024xf32>
    %13 = arith.addf %11, %12 : vector<2x1024xf32>
    %c0_4 = arith.constant 0 : index
    %c0_5 = arith.constant 0 : index
    %14 = vector.load %arg3[%c0_4, %c0_5] : memref<2x1024xf32, #tpu.memory_space<vmem>>, vector<2x1024xf32>
    tpu.vector_store %arg3[%c0_4, %c0_5], %13 {strides = array<i32>} : memref<2x1024xf32, #tpu.memory_space<vmem>>, vector<2x1024xf32>,
    return
  }
  func.func @transform_0(%arg0: i32) -> i32 {
    %c0_i32 = arith.constant 0 : i32
    %c0_i32_0 = arith.constant 0 : i32
    return %c0_i32 : i32
  }
  func.func @transform_1(%arg0: i32) -> (i32, i32) {
    %c0_i32 = arith.constant 0 : i32
    %c0_i32_0 = arith.constant 0 : i32
    return %arg0, %c0_i32 : i32, i32
  }
  func.func @transform_2(%arg0: i32) -> (i32, i32) {
    %c0_i32 = arith.constant 0 : i32
    %c0_i32_0 = arith.constant 0 : i32
    return %arg0, %c0_i32 : i32, i32
  }
}

</mosaic_0001>

<bundles_post_ra>
// kernel: tpu_custom_call.1
= control target key start
LH: loop header
LB: loop body
LE: loop exit
PB: predicated region body
PF: predicated region fallthrough
CT: control target
= control target key end

     0   :  { %7 = vsyncpa [#allocation5], 0  ;;  %s178_s0 = inlined_call_operand.hbm [shape: f32[2], index: 0, kind: input, shape index: {}]   ;;  %s179_s1 = inlined_call_operand.hbm [shape: f32[2,1024], index: 1, kind: input, shape index: {}]   ;;  %s180_s2 = inlined_call_operand.hbm [shape: f32[2,1024], index: 2, kind: output, shape index: {}]  }
   0x1   :  { %8 = vsyncpa [#allocation3], 0 }
   0x2   :  { %9 = vsyncpa [#allocation4], 0  ;;  %s15_s11 = sshll.u32 %s178_s0, 4  ;;  %s24_s14 = sshll.u32 %s179_s1, 4  ;;  %s16_s11 = int_to_ptr.hbm [resolvable:$true] %s15_s11  ;;  %s25_s14 = int_to_ptr.hbm [resolvable:$true] %s24_s14 }
   0x3   :  { %s151_s15 = smov [#allocation2]   ;;  %s152_s16 = smov [#allocation6]  }
   0x4   :  { %18 = dma.hbm_to_smem %s16_s11, 16, %s151_s15, [#allocation5]  }
   0x5   :  { %s26_s17 = sshll.u32 %s152_s16, 4  ;;  %s27_s17 = int_to_ptr.vmem [resolvable:$true] %s26_s17 }
   0x6   :  { %29 = dma.hbm_to_vmem [thread:$0]  %s25_s14, 256, %s27_s17, [#allocation3]  }
   0x7   :  { %145 = dma.done.wait [#allocation5], 16  }
   0x8   :  { %146 = vsyncadd [#allocation5], 4294967280 }
   0x9   :  { %147 = dma.done.wait [#allocation3], 256  }
   0xa   :  { %148 = vsyncadd [#allocation3], 4294967040 }
   0xb   :  { %38 = sfence }
   0xc   :  { %s39_s18 = sld [smem:[#allocation2]]  ;;  %v41_v0 = vld [vmem:[#allocation6] sm:$0xff]  ;;  %v42_v1 = vld [vmem:[#allocation6 + $0x8] sm:$0xff]  ;;  %s153_s0 = smov [#allocation7]  }
   0xd   :  { %s77_s19 = sld [smem:[#allocation2 + $0x1]]  ;;  %s64_s1 = sshll.u32 %s153_s0, 4  ;;  %s65_s1 = int_to_ptr.vmem [resolvable:$true] %s64_s1 }
   0xe   :  { %s66_s22 = sshll.u32 %s180_s2, 4  ;;  %s67_s22 = int_to_ptr.hbm [resolvable:$true] %s66_s22 }
  0x12   :  { %v46_v3 = vstv %s39_s18 }
  0x13   :  { %v43_v2 = vstv %s77_s19 }
  0x14   :  { %v44_v4 = vsub.f32 %v41_v0, %v43_v2  ;;  %v45_v5 = vsub.f32 %v42_v1, %v43_v2 }
  0x16   :  { %v47_v6 = vmul.f32 %v46_v3, %v44_v4  ;;  %v48_v7 = vmul.f32 %v46_v3, %v45_v5 }
  0x18   :  { %v49_v8 = vmul.f32 0.5, %v47_v6  ;;  %v50_v9 = vmul.f32 0.5, %v48_v7 }
  0x1a   :  { %81 = vtanh.f32 %v49_v8 }
  0x1b   :  { %83 = vtanh.f32 %v50_v9 }
  0x20   :  { %v82_v10 = vpop.eup %81 }
  0x21   :  { %v84_v11 = vpop.eup %83  ;;  %v53_v12 = vmul.f32 0.5, %v82_v10 }
  0x22   :  { %v54_v13 = vmul.f32 0.5, %v84_v11 }
  0x23   :  { %v55_v14 = vadd.f32 0.5, %v53_v12 }
  0x24   :  { %v56_v15 = vadd.f32 0.5, %v54_v13 }
  0x25   :  { %57 = vst [vmem:[#allocation7] sm:$0xff] %v55_v14 }
  0x26   :  { %58 = vst [vmem:[#allocation7 + $0x8] sm:$0xff] %v56_v15 }
  0x27   :  { %69 = dma.vmem_to_hbm [thread:$0]  %s65_s1, 256, %s67_s22, [#allocation4]  }
  0x28   :  { %149 = dma.done.wait [#allocation4], 256  }
  0x29   :  { %150 = vsyncadd [#allocation4], 4294967040 }
  0x2a   :  { %74 = vsyncpa [#allocation3], 1 }
  0x2b   :  { %75 = vsyncpa [#allocation4], 1 }
  0x2c   :  { %76 = vsyncpa [#allocation5], 1 }

</bundles_post_ra>
